<compile_context>
chip_gen: v7x
topology: tpu7x:2x2x1
jax: 0.10.0
libtpu: 0.0.40
codegen_flags: <defaults>
</compile_context>

<pallas_src>
import functools

import jax
import jax.numpy as jnp
from jax.experimental import pallas as pl
from jax.experimental.pallas import tpu as pltpu


def _ce_smooth_kernel(logits_ref, target_ref, out_ref, *,
                      smooth_factor, num_classes, batch_size, block_rows):
    x = logits_ref[...]                                   # (TB, C) storage dtype
    tgt = target_ref[...]                                 # (TB, 1) int32
    tb, c = x.shape

    # Stable log-softmax normalizer: logZ = m + log(sum(exp(x - m))).
    # max is exact in the storage dtype; exp/LSE accumulate in f32 (cast fuses
    # into the reduction -- no persistent f32 tile).
    m = jnp.max(x, axis=1, keepdims=True).astype(jnp.float32)              # (TB,1)
    lse = jnp.log(jnp.sum(jnp.exp(x.astype(jnp.float32) - m),
                          axis=1, keepdims=True))                          # (TB,1)
    logz = m + lse                                                         # (TB,1)

    # Single weighted reduction replaces separate x_t and sum_x:
    #   smooth_target_c = s/C + (1-s)*[c == t],  sum_c smooth_target_c == 1
    #   per_row = -(sum_c smooth_target_c * (x_c - logZ)) = logZ - sum_c st_c*x_c
    s = smooth_factor
    w_hit = jnp.float32(1.0 - s + s / num_classes)
    w_miss = jnp.float32(s / num_classes)
    col = jax.lax.broadcasted_iota(jnp.int32, (tb, c), 1)
    wt = jnp.where(col == tgt, w_hit, w_miss)                              # (TB,C)
    dot = jnp.sum(wt * x.astype(jnp.float32), axis=1, keepdims=True)       # (TB,1)

    per_row = logz - dot                                                   # (TB,1)

    # Mask rows beyond the true batch (ragged last tile: garbage rows may hold
    # NaN/Inf after the reductions; the select fully neutralizes them).
    row0 = pl.program_id(0) * block_rows
    row_idx = row0 + jax.lax.broadcasted_iota(jnp.int32, (tb, 1), 0)
    per_row = jnp.where(row_idx < batch_size, per_row, 0.0)

    # One partial sum per tile, broadcast across 128 lanes (lane-dense store).
    partial = jnp.sum(per_row, axis=0, keepdims=True)                      # (1,1)
    out_ref[...] = jnp.broadcast_to(partial, out_ref.shape)                # (1,128)


def _round_up(x, m):
    return (x + m - 1) // m * m


def _choose_block_rows(batch, num_classes, itemsize, target_bytes=4 << 20):
    """Batch-tile size giving ~target_bytes of *storage-dtype* logits per buffer.

    Accounts for lane padding of the class axis to a multiple of 128 and for
    the input dtype width (bf16 DMA buffers hold 2x the rows of f32 ones).
    """
    c_pad = _round_up(max(int(num_classes), 1), 128)
    rows = target_bytes // (c_pad * int(itemsize))
    rows = max(16, (rows // 16) * 16)            # multiple of 16 (bf16 sublane pack)
    rows = min(rows, _round_up(int(batch), 16))
    return int(rows)


def _vmem_limit_bytes(block_rows, num_classes, itemsize):
    """Explicit scoped-VMEM budget: 2x double-buffered inputs + ~3x tile-sized
    f32 transients (per-consumer casts / exp / weight tile) + headroom.

    The Pallas scoped default is 16 MiB (v5e) / 32 MiB (v6e, v7x); physical is
    128 MiB (v5e/v6e) / 64 MiB per TC (v7x), so values up to ~48 MiB are safe
    on every generation.
    """
    c_pad = _round_up(max(int(num_classes), 1), 128)
    logits_buf = block_rows * c_pad * int(itemsize)
    target_buf = block_rows * 128 * 4            # lane-padded int32 column
    f32_tile = block_rows * c_pad * 4
    total = 2 * logits_buf + 2 * target_buf + 3 * f32_tile + (4 << 20)
    return int(max(total, 16 << 20))


def cross_entropy_smooth(logits, target, *, smooth_factor, num_classes,
                         block_rows=None):
    """Label-smoothed cross entropy.

    logits: (B, C) float (bf16 in HBM recommended, esp. on v5e; kernel math f32).
    target: (B,) integer class indices.
    Returns a scalar f32 loss identical to PyTorch CrossEntropySmooth.forward.
    """
    B, C = logits.shape
    assert C == num_classes

    itemsize = jnp.dtype(logits.dtype).itemsize
    tb = int(block_rows) if block_rows else _choose_block_rows(B, C, itemsize)
    num_tiles = pl.cdiv(B, tb)                   # ragged last tile handled in-kernel

    target_2d = target.reshape(B, 1).astype(jnp.int32)

    kernel = functools.partial(
        _ce_smooth_kernel,
        smooth_factor=float(smooth_factor),
        num_classes=int(num_classes),
        batch_size=int(B),
        block_rows=tb,
    )

    partials = pl.pallas_call(
        kernel,
        out_shape=jax.ShapeDtypeStruct((num_tiles, 128), jnp.float32),
        grid=(num_tiles,),
        in_specs=[
            pl.BlockSpec((tb, C), lambda i: (i, 0)),
            pl.BlockSpec((tb, 1), lambda i: (i, 0)),
        ],
        out_specs=pl.BlockSpec((1, 128), lambda i: (i, 0)),
        # Each grid step writes its own output block -> fully parallel, so the
        # batch-tile axis can be sharded across both TensorCores on v7x.
        compiler_params=pltpu.CompilerParams(
            dimension_semantics=("parallel",),
            vmem_limit_bytes=_vmem_limit_bytes(tb, C, itemsize),
        ),
    )(logits, target_2d)

    # Final reduction over a handful of per-tile scalars is negligible in JAX.
    return jnp.sum(partials[:, 0]) / B

    # TODO(synk): for LM-scale vocabularies (C too wide for one lane-dim block),
    # add a class-axis grid dimension with an online logsumexp accumulator; the
    # class-block size should be chosen per generation (v7x has 64 MiB VMEM per
    # TC, half of v5e/v6e) so TB doesn't collapse to sublane-thin tiles.


def _reference(logits, target, smooth_factor, num_classes):
    one_hot = jax.nn.one_hot(target, num_classes, dtype=jnp.float32)
    smooth_target = (1.0 - smooth_factor) * one_hot + smooth_factor / num_classes
    log_probs = jax.nn.log_softmax(logits.astype(jnp.float32), axis=1)
    return -(smooth_target * log_probs).sum(axis=1).mean()


if __name__ == "__main__":
    # Small shapes consistent with the module: batch=8, num_classes=32.
    B, C = 8, 32
    smooth_factor = 0.1

    key = jax.random.PRNGKey(0)
    k_logits, k_target = jax.random.split(key)
    logits = jax.random.normal(k_logits, (B, C), dtype=jnp.float32)
    target = jax.random.randint(k_target, (B,), 0, C, dtype=jnp.int32)

    loss = cross_entropy_smooth(
        logits, target, smooth_factor=smooth_factor, num_classes=C
    )
    loss = jax.block_until_ready(loss)

    ref = _reference(logits, target, smooth_factor, C)
    assert jnp.allclose(loss, ref, rtol=1e-5, atol=1e-5), (loss, ref)

    # bf16-in-HBM path + ragged batch (B not a multiple of TB, no wrapper pad).
    B2, C2 = 20, 40
    k1, k2 = jax.random.split(jax.random.PRNGKey(1))
    logits2 = jax.random.normal(k1, (B2, C2), dtype=jnp.float32)
    target2 = jax.random.randint(k2, (B2,), 0, C2, dtype=jnp.int32)
    logits2_bf16 = logits2.astype(jnp.bfloat16)

    loss2 = cross_entropy_smooth(
        logits2_bf16, target2, smooth_factor=smooth_factor, num_classes=C2,
        block_rows=16,
    )
    loss2 = jax.block_until_ready(loss2)
    ref2 = _reference(logits2_bf16.astype(jnp.float32), target2, smooth_factor, C2)
    assert jnp.allclose(loss2, ref2, rtol=1e-3, atol=1e-3), (loss2, ref2)

    print("KERNEL_OK")
</pallas_src>

<mosaic_0001>
module attributes {stable_mosaic.version = 11 : i64} {
  func.func @_ce_smooth_kernel(%arg0: i32, %arg1: memref<16x32xf32, #tpu.memory_space<vmem>>, %arg2: memref<16x1xi32, #tpu.memory_space<vmem>>, %arg3: memref<1x128xf32, #tpu.memory_space<vmem>>) attributes {dimension_semantics = [#tpu.dimension_semantics<parallel>], iteration_bounds = array<i64: 1>, scalar_prefetch = 0 : i64, scratch_operands = 0 : i64, tpu.core_type = #tpu.core_type<tc>, window_params = [{transform_indices = @transform_0, window_bounds = array<i64: 16, 32>}, {transform_indices = @transform_1, window_bounds = array<i64: 16, 1>}, {transform_indices = @transform_2, window_bounds = array<i64: 1, 128>}]} {
    %c0 = arith.constant 0 : index
    %c0_0 = arith.constant 0 : index
    %0 = vector.load %arg1[%c0, %c0_0] : memref<16x32xf32, #tpu.memory_space<vmem>>, vector<16x32xf32>
    %c0_1 = arith.constant 0 : index
    %c0_2 = arith.constant 0 : index
    %1 = vector.load %arg2[%c0_1, %c0_2] : memref<16x1xi32, #tpu.memory_space<vmem>>, vector<16x1xi32>
    %cst = arith.constant dense<0xFF800000> : vector<16xf32>
    %2 = vector.multi_reduction <maximumf>, %0, %cst [1] : vector<16x32xf32> to vector<16xf32>
    %3 = vector.shape_cast %2 : vector<16xf32> to vector<16x1xf32>
    %4 = vector.broadcast %3 : vector<16x1xf32> to vector<16x32xf32>
    %5 = arith.subf %0, %4 : vector<16x32xf32>
    %6 = math.exp %5 : vector<16x32xf32>
    %cst_3 = arith.constant dense<0.000000e+00> : vector<16xf32>
    %7 = vector.multi_reduction <add>, %6, %cst_3 [1] : vector<16x32xf32> to vector<16xf32>
    %8 = vector.shape_cast %7 : vector<16xf32> to vector<16x1xf32>
    %9 = math.log %8 : vector<16x1xf32>
    %10 = arith.addf %3, %9 : vector<16x1xf32>
    %11 = tpu.iota {dimensions = array<i32: 1>} : vector<16x32xi32>
    %12 = vector.broadcast %1 : vector<16x1xi32> to vector<16x32xi32>
    %13 = arith.cmpi eq, %11, %12 : vector<16x32xi32>
    %cst_4 = arith.constant 0.903124988 : f32
    %cst_5 = arith.constant 3.125000e-03 : f32
    %14 = vector.broadcast %cst_4 : f32 to vector<16x32xf32>
    %15 = vector.broadcast %cst_5 : f32 to vector<16x32xf32>
    %16 = arith.select %13, %14, %15 : vector<16x32xi1>, vector<16x32xf32>
    %17 = arith.mulf %16, %0 : vector<16x32xf32>
    %cst_6 = arith.constant dense<0.000000e+00> : vector<16xf32>
    %18 = vector.multi_reduction <add>, %17, %cst_6 [1] : vector<16x32xf32> to vector<16xf32>
    %19 = vector.shape_cast %18 : vector<16xf32> to vector<16x1xf32>
    %20 = arith.subf %10, %19 : vector<16x1xf32>
    %c16_i32 = arith.constant 16 : i32
    %21 = arith.muli %arg0, %c16_i32 : i32
    %22 = tpu.iota {dimensions = array<i32: 0>} : vector<16x1xi32>
    %23 = vector.broadcast %21 : i32 to vector<16x1xi32>
    %24 = arith.addi %23, %22 : vector<16x1xi32>
    %c8_i32 = arith.constant 8 : i32
    %25 = vector.broadcast %c8_i32 : i32 to vector<16x1xi32>
    %26 = arith.cmpi slt, %24, %25 : vector<16x1xi32>
    %cst_7 = arith.constant 0.000000e+00 : f32
    %27 = vector.broadcast %cst_7 : f32 to vector<16x1xf32>
    %28 = arith.select %26, %20, %27 : vector<16x1xi1>, vector<16x1xf32>
    %cst_8 = arith.constant dense<0.000000e+00> : vector<1xf32>
    %29 = vector.multi_reduction <add>, %28, %cst_8 [0] : vector<16x1xf32> to vector<1xf32>
    %30 = vector.shape_cast %29 : vector<1xf32> to vector<1x1xf32>
    %31 = vector.shape_cast %30 : vector<1x1xf32> to vector<1x1xf32>
    %32 = vector.broadcast %31 : vector<1x1xf32> to vector<1x128xf32>
    %c0_9 = arith.constant 0 : index
    %c0_10 = arith.constant 0 : index
    %33 = vector.load %arg3[%c0_9, %c0_10] : memref<1x128xf32, #tpu.memory_space<vmem>>, vector<1x128xf32>
    tpu.vector_store %arg3[%c0_9, %c0_10], %32 {strides = array<i32>} : memref<1x128xf32, #tpu.memory_space<vmem>>, vector<1x128xf32>,
    return
  }
  func.func @transform_0(%arg0: i32) -> (i32, i32) {
    %c0_i32 = arith.constant 0 : i32
    %c0_i32_0 = arith.constant 0 : i32
    return %arg0, %c0_i32 : i32, i32
  }
  func.func @transform_1(%arg0: i32) -> (i32, i32) {
    %c0_i32 = arith.constant 0 : i32
    %c0_i32_0 = arith.constant 0 : i32
    return %arg0, %c0_i32 : i32, i32
  }
  func.func @transform_2(%arg0: i32) -> (i32, i32) {
    %c0_i32 = arith.constant 0 : i32
    %c0_i32_0 = arith.constant 0 : i32
    return %arg0, %c0_i32 : i32, i32
  }
}

</mosaic_0001>

<bundles_post_ra>
// kernel: tpu_custom_call.1
= control target key start
LH: loop header
LB: loop body
LE: loop exit
PB: predicated region body
PF: predicated region fallthrough
CT: control target
= control target key end

     0   :  { %vm16_vm0 = vcmask 261120   ;;  %s167_s0 = inlined_call_operand.vmem [shape: f32[8,32], index: 0, kind: input, shape index: {}]   ;;  %s168_s1 = inlined_call_operand.vmem [shape: s32[8,1], index: 1, kind: input, shape index: {}]   ;;  %s169_s2 = inlined_call_operand.hbm [shape: f32[1,128], index: 2, kind: output, shape index: {}]  }
   0x1   :  { %v12_v0 = vld [vmem:[%s167_s0] sm:$0xff] }
   0x2   :  { %7 = vsyncpa [#allocation3], 0  ;;  %v17_v1 = vsel %vm16_vm0, %v12_v0, -inf  ;;  %v128_v2 = vmov 0   ;;  %v14_v3 = vld [vmem:[%s168_s1] sm:$0xff]  ;;  %v41_v6 = vlaneseq  ;;  %s130_s0 = smov [#allocation2]  }
   0x3   :  { %99 = vset.pattern.permute.xlu0 %v128_v2  ;;  %v129_v10 = vmov 0.003125   ;;  %s88_s1 = sshll.u32 %s130_s0, 4  ;;  %s89_s1 = int_to_ptr.vmem [resolvable:$true] %s88_s1 }
   0x4   :  { %18 = vmax.xlane.f32.xlu0 %v17_v1  ;;  %v42_v8 = vand.u32 127, %v41_v6  ;;  %s104_s13 = scalar_lea.vmem %s89_s1, 16  ;;  %s108_s14 = scalar_lea.vmem %s89_s1, 32 }
   0x5   :  { %p105_p0 = scmp.ne.s32.totalorder %s89_s1, %s104_s13  ;;  %p109_p1 = scmp.lt.s32.totalorder %s89_s1, %s89_s1 }
   0x6   :  { %p110_p2 = scmp.lt.s32.totalorder %s108_s14, %s104_s13 }
   0x8   :  { %p111_p3 = por %p110_p2, %p109_p1 }
   0xa   :  { %p112_p4 = pnand %p111_p3, %p105_p0 }
  0x1a   :  { %44 = vperm.xlu0 %99, %v14_v3  }
  0x91   :  { %v19_v4 = vpop.xlane.xlu0 %18 }
  0x92   :  { %v23_v5 = vsub.f32 %v12_v0, %v19_v4 }
  0x94   :  { %v25_v7 = vmul.f32 1.442695, %v23_v5 }
  0x96   :  { %100 = vpow2.f32 %v25_v7 }
  0x99   :  { %v45_v9 = vpop.permute.xlu0 %44 }
  0x9a   :  { %vm49_vm1 = vcmp.eq.s32.totalorder %v42_v8, %v45_v9 }
  0x9b   :  { %v51_v11 = vsel %vm49_vm1, 0.903125, %v129_v10 }
  0x9c   :  { %v53_v12 = vmul.f32 %v51_v11, %v12_v0 }
  0x9e   :  { %v55_v15 = vsel %vm16_vm0, %v53_v12, 0.0 }
  0xa0   :  { %v101_v13 = vpop.eup %100 }
  0xa1   :  { %v29_v14 = vsel %vm16_vm0, %v101_v13, 0.0 }
  0xa2   :  { %30 = vadd.xlane.f32.xlu1 %v29_v14 }
  0xa6   :  { %56 = vadd.xlane.f32.xlu1 %v55_v15 }
 0x12f   :  { %v31_v16 = vpop.xlane.xlu1 %30 }
 0x130   :  { %102 = vlog2.f32 %v31_v16 }
 0x133   :  { %v57_v19 = vpop.xlane.xlu1 %56 }
 0x13a   :  { %v103_v17 = vpop.eup %102 }
 0x13b   :  { %v36_v18 = vmul.f32 0.6931472, %v103_v17 }
 0x13d   :  { %v39_v20 = vadd.f32 %v36_v18, %v19_v4 }
 0x13f   :  { %v61_v21 = vsub.f32 %v39_v20, %v57_v19 }
 0x141   :  { %v75_v22 = vrot.slane %v61_v21, 4 }
 0x143   :  { %v76_v23 = vadd.f32 %v75_v22, %v61_v21 }
 0x145   :  { %v77_v24 = vrot.slane %v76_v23, 2 }
 0x147   :  { %v78_v25 = vadd.f32 %v77_v24, %v76_v23 }
 0x149   :  { %v79_v26 = vrot.slane %v78_v25, 1 }
 0x14b   :  { %v80_v27 = vadd.f32 %v79_v26, %v78_v25 }
 0x14d   :  { %81 = vst [vmem:[#allocation2] sm:$0x1] %v80_v27 }
 0x14e   :  { %115 = shalt.err (!%p112_p4)
}
 0x14f   :  { %s116_s17 = scalar_lea.hbm %s169_s2, 16 }
 0x150   :  { %p117_p5 = scmp.ne.s32.totalorder %s169_s2, %s116_s17  ;;  %p120_p6 = scmp.lt.u32.totalorder %s116_s17, %s169_s2 }
 0x152   :  { %p122_p7 = pnand %p120_p6, %p117_p5 }
 0x154   :  { %125 = shalt.err (!%p122_p7)
}
 0x155   :  { %91 = dma.vmem_to_hbm [thread:$0]  %s89_s1, 16, %s169_s2, [#allocation3]  }
 0x156   :  { %126 = dma.done.wait [#allocation3], 16  }
 0x157   :  { %127 = vsyncadd [#allocation3], 4294967280 }
 0x158   :  { %95 = vsyncpa [#allocation3], 1 }

</bundles_post_ra>
